<compile_context>
chip_gen: v5e
topology: v5e:2x2
jax: 0.10.0
libtpu: 0.0.40
codegen_flags: <defaults>
</compile_context>

<pallas_src>
import functools

import jax
import jax.numpy as jnp
from jax.experimental import pallas as pl
from jax.experimental.pallas import tpu as pltpu


def _round_up(a, b):
    return (a + b - 1) // b * b


def _cdiv(a, b):
    return (a + b - 1) // b


# ----------------------------------------------------------------------------
# Kernels
# ----------------------------------------------------------------------------
def _ffn_kernel_f32out(x_ref, w1_ref, b1_ref, w2_ref, b2_ref, o_ref):
    # f32 output: accumulate directly in the resident output block (no scratch).
    fk = pl.program_id(1)

    @pl.when(fk == 0)
    def _init():
        # Seed the accumulator with the output bias (added exactly once).
        o_ref[...] = jnp.broadcast_to(b2_ref[...], o_ref.shape)

    h = jnp.dot(x_ref[...], w1_ref[...], preferred_element_type=jnp.float32)
    h = jnp.maximum(h + b1_ref[...], 0.0)          # bias lives along F -> per-chunk
    # dropout (eval/inference mode) == identity
    o_ref[...] += jnp.dot(h.astype(w2_ref.dtype), w2_ref[...],
                          preferred_element_type=jnp.float32)


def _ffn_kernel_acc(x_ref, w1_ref, b1_ref, w2_ref, b2_ref, o_ref, acc_ref):
    # Non-f32 output: accumulate in an f32 VMEM scratch, cast on finalize.
    fk = pl.program_id(1)

    @pl.when(fk == 0)
    def _init():
        acc_ref[...] = jnp.zeros_like(acc_ref)

    h = jnp.dot(x_ref[...], w1_ref[...], preferred_element_type=jnp.float32)
    h = jnp.maximum(h + b1_ref[...], 0.0)
    # dropout (eval/inference mode) == identity
    acc_ref[...] += jnp.dot(h.astype(w2_ref.dtype), w2_ref[...],
                            preferred_element_type=jnp.float32)

    @pl.when(fk == pl.num_programs(1) - 1)
    def _finalize():
        o_ref[...] = (acc_ref[...] + b2_ref[...]).astype(o_ref.dtype)


# ----------------------------------------------------------------------------
# Tile / VMEM budgeting
# ----------------------------------------------------------------------------
def _vmem_capacity_bytes():
    try:
        info = pltpu.get_tpu_info()
        cap = getattr(info, "vmem_capacity_bytes", None)
        if cap:
            return int(cap)
    except Exception:
        pass
    return 64 << 20  # conservative fallback (smallest per-core VMEM: v7x)


def _select_tiles(M, E, F, c_size, o_size, needs_acc, capacity):
    """Choose (tm, tf, Fp) and estimate the per-step VMEM footprint in bytes."""
    Mp8 = _round_up(max(M, 1), 8)
    Fp = _round_up(max(F, 1), 128)                 # pad hidden dim only to 128
    budget = max(int(capacity * 0.80), 16 << 20)   # headroom for compiler scratch
    small_vmem_dual_tc = capacity <= (96 << 20)    # v7x-like: 64 MiB VMEM, 2 TCs

    # Weights re-stream per row tile -> arithmetic intensity ~ tm. Grow tm as
    # far as VMEM allows: ~1024 on 128 MiB parts (v5e/v6e), ~512 on 64 MiB.
    tm = min(512 if small_vmem_dual_tc else 1024, Mp8)
    # Keep >= 2 row tiles on dual-TC parts so the parallel axis can split.
    if small_vmem_dual_tc and Mp8 >= 512 and tm >= Mp8:
        tm = _round_up(_cdiv(Mp8, 2), 8)

    # Prefer tf == Fp (weights grid-resident, single DMA); otherwise a
    # 128-multiple divisor of Fp.
    tf_cands = [Fp] + [t for t in (512, 384, 256, 128) if t < Fp and Fp % t == 0]

    def footprint(tm_, tf_):
        fp = 2 * tm_ * E * c_size          # x tile (double buffered)
        fp += 2 * E * tf_ * c_size         # w1 chunk
        fp += 2 * tf_ * E * c_size         # w2 chunk
        fp += 2 * tf_ * 4 + 2 * E * 4      # b1 / b2 (f32)
        fp += 2 * tm_ * E * o_size         # output tile
        if needs_acc:
            fp += tm_ * E * 4              # f32 accumulator scratch
        return fp

    while True:
        for tf in tf_cands:
            if footprint(tm, tf) <= budget:
                return tm, tf, Fp, footprint(tm, tf)
        if tm <= 64:
            tf = tf_cands[-1]
            return tm, tf, Fp, footprint(tm, tf)
        tm = max(64, _round_up(tm // 2, 8))


# ----------------------------------------------------------------------------
# Wrapper
# ----------------------------------------------------------------------------
@functools.partial(jax.jit, static_argnames=("compute_dtype",))
def feed_forward(x, w1, b1, w2, b2, *, compute_dtype=None):
    """x: (B, S, E) -> (B, S, E). Fused Linear -> ReLU -> [dropout] -> Linear.

    Weights are transposed vs. PyTorch nn.Linear: w1 (E, F), w2 (F, E).
    compute_dtype (e.g. jnp.bfloat16) casts the MXU operands; accumulation is
    always f32 and the output keeps x.dtype.
    """
    B, S, E = x.shape
    _, F = w1.shape
    M = B * S

    out_dtype = x.dtype
    c_dtype = jnp.dtype(compute_dtype) if compute_dtype is not None else jnp.dtype(x.dtype)
    needs_acc = jnp.dtype(out_dtype) != jnp.dtype(jnp.float32)

    capacity = _vmem_capacity_bytes()
    tm, tf, Fp, fp_bytes = _select_tiles(
        M, E, F, c_dtype.itemsize, jnp.dtype(out_dtype).itemsize, needs_acc, capacity)
    Mp = _round_up(M, tm)

    x2d = x.reshape(M, E).astype(c_dtype)
    w1c = w1.astype(c_dtype)
    w2c = w2.astype(c_dtype)
    if Mp != M:                                    # pad tokens instead of asserting
        x2d = jnp.pad(x2d, ((0, Mp - M), (0, 0)))
    if Fp != F:                                    # zero-pad hidden dim (exact: relu(0)=0)
        w1c = jnp.pad(w1c, ((0, 0), (0, Fp - F)))
        b1 = jnp.pad(b1, ((0, Fp - F),))
        w2c = jnp.pad(w2c, ((0, Fp - F), (0, 0)))

    b1_2d = b1.reshape(1, Fp).astype(jnp.float32)
    b2_2d = b2.reshape(1, E).astype(jnp.float32)

    grid = (Mp // tm, Fp // tf)

    # Truthful HBM-traffic estimate: weights stream once per row tile unless
    # tf == Fp (constant block index -> single fetch for the whole grid).
    w_reps = 1 if tf == Fp else grid[0]
    c_sz = c_dtype.itemsize
    bytes_accessed = (Mp * E * c_sz
                      + w_reps * (E * Fp + Fp * E) * c_sz
                      + Fp * 4 + E * 4
                      + Mp * E * jnp.dtype(out_dtype).itemsize)
    cost = pl.CostEstimate(flops=4 * Mp * E * Fp, transcendentals=0,
                           bytes_accessed=bytes_accessed)

    # Explicit scoped-VMEM budget sized from the real footprint, with headroom.
    vmem_limit = int(min(max(2 * fp_bytes, fp_bytes + (4 << 20), 32 << 20),
                         capacity - (8 << 20)))

    kernel = _ffn_kernel_acc if needs_acc else _ffn_kernel_f32out
    scratch = [pltpu.VMEM((tm, E), jnp.float32)] if needs_acc else []

    out2d = pl.pallas_call(
        kernel,
        out_shape=jax.ShapeDtypeStruct((Mp, E), out_dtype),
        grid_spec=pltpu.PrefetchScalarGridSpec(
            num_scalar_prefetch=0,
            grid=grid,
            in_specs=[
                pl.BlockSpec((tm, E), lambda i, k: (i, 0)),    # x row tile
                pl.BlockSpec((E, tf), lambda i, k: (0, k)),    # w1 F-chunk
                pl.BlockSpec((1, tf), lambda i, k: (0, k)),    # b1 F-chunk
                pl.BlockSpec((tf, E), lambda i, k: (k, 0)),    # w2 F-chunk
                pl.BlockSpec((1, E), lambda i, k: (0, 0)),     # b2 (resident)
            ],
            out_specs=pl.BlockSpec((tm, E), lambda i, k: (i, 0)),
            scratch_shapes=scratch,
        ),
        compiler_params=pltpu.CompilerParams(
            dimension_semantics=("parallel", "arbitrary"),
            vmem_limit_bytes=vmem_limit),
        cost_estimate=cost,
    )(x2d, w1c, b1_2d, w2c, b2_2d)

    if Mp != M:
        out2d = out2d[:M]
    return out2d.reshape(B, S, E)


def _reference(x, w1, b1, w2, b2):
    h = jnp.maximum(x @ w1 + b1, 0.0)
    return h @ w2 + b2


if __name__ == "__main__":
    # Small shapes implied by the module: tokens of dim embed_dim.
    batch, seq, embed_dim, ffn_dim = 2, 8, 32, 64

    key = jax.random.PRNGKey(0)
    kx, kw1, kb1, kw2, kb2 = jax.random.split(key, 5)

    x = jax.random.normal(kx, (batch, seq, embed_dim), dtype=jnp.float32)
    # PyTorch Linear weight is (out, in); stored here transposed as (in, out).
    w1 = jax.random.normal(kw1, (embed_dim, ffn_dim), dtype=jnp.float32) * 0.05
    b1 = jax.random.normal(kb1, (ffn_dim,), dtype=jnp.float32) * 0.05
    w2 = jax.random.normal(kw2, (ffn_dim, embed_dim), dtype=jnp.float32) * 0.05
    b2 = jax.random.normal(kb2, (embed_dim,), dtype=jnp.float32) * 0.05

    ref = _reference(x, w1, b1, w2, b2)

    # 1) Full-precision path (matches reference tightly).
    out = jax.block_until_ready(feed_forward(x, w1, b1, w2, b2))
    assert out.shape == (batch, seq, embed_dim)
    assert jnp.allclose(out, ref, atol=1e-5, rtol=1e-5), "f32 mismatch vs reference"

    # 2) Mixed-precision path (bf16 MXU operands, f32 accumulation/output).
    out_bf16 = jax.block_until_ready(
        feed_forward(x, w1, b1, w2, b2, compute_dtype=jnp.bfloat16))
    assert out_bf16.shape == (batch, seq, embed_dim)
    assert jnp.allclose(out_bf16, ref, atol=5e-2, rtol=5e-2), "bf16 mismatch vs reference"

    print("KERNEL_OK")
</pallas_src>

<mosaic_0001>
module attributes {stable_mosaic.version = 11 : i64} {
  func.func @_ffn_kernel_f32out(%arg0: i32, %arg1: i32, %arg2: memref<16x32xf32, #tpu.memory_space<vmem>>, %arg3: memref<32x128xf32, #tpu.memory_space<vmem>>, %arg4: memref<1x128xf32, #tpu.memory_space<vmem>>, %arg5: memref<128x32xf32, #tpu.memory_space<vmem>>, %arg6: memref<1x32xf32, #tpu.memory_space<vmem>>, %arg7: memref<16x32xf32, #tpu.memory_space<vmem>>) attributes {dimension_semantics = [#tpu.dimension_semantics<parallel>, #tpu.dimension_semantics<arbitrary>], iteration_bounds = array<i64: 1, 1>, scalar_prefetch = 0 : i64, scratch_operands = 0 : i64, tpu.core_type = #tpu.core_type<tc>, window_params = [{transform_indices = @transform_0, window_bounds = array<i64: 16, 32>}, {transform_indices = @transform_1, window_bounds = array<i64: 32, 128>}, {transform_indices = @transform_2, window_bounds = array<i64: 1, 128>}, {transform_indices = @transform_3, window_bounds = array<i64: 128, 32>}, {pipeline_mode = #tpu.pipeline_mode<synchronous>, transform_indices = @transform_4, window_bounds = array<i64: 1, 32>}, {transform_indices = @transform_5, window_bounds = array<i64: 16, 32>}]} {
    %c0_i32 = arith.constant 0 : i32
    %0 = arith.cmpi eq, %arg1, %c0_i32 : i32
    %1 = arith.extui %0 : i1 to i32
    %c0_i32_0 = arith.constant 0 : i32
    %2 = arith.cmpi ne, %1, %c0_i32_0 : i32
    scf.if %2 {
      %c0_14 = arith.constant 0 : index
      %c0_15 = arith.constant 0 : index
      %16 = vector.load %arg6[%c0_14, %c0_15] : memref<1x32xf32, #tpu.memory_space<vmem>>, vector<1x32xf32>
      %17 = vector.shape_cast %16 : vector<1x32xf32> to vector<1x32xf32>
      %18 = vector.broadcast %17 : vector<1x32xf32> to vector<16x32xf32>
      %c0_16 = arith.constant 0 : index
      %c0_17 = arith.constant 0 : index
      %19 = vector.load %arg7[%c0_16, %c0_17] : memref<16x32xf32, #tpu.memory_space<vmem>>, vector<16x32xf32>
      tpu.vector_store %arg7[%c0_16, %c0_17], %18 {strides = array<i32>} : memref<16x32xf32, #tpu.memory_space<vmem>>, vector<16x32xf32>,
    } else {
    }
    %c0 = arith.constant 0 : index
    %c0_1 = arith.constant 0 : index
    %3 = vector.load %arg2[%c0, %c0_1] : memref<16x32xf32, #tpu.memory_space<vmem>>, vector<16x32xf32>
    %c0_2 = arith.constant 0 : index
    %c0_3 = arith.constant 0 : index
    %4 = vector.load %arg3[%c0_2, %c0_3] : memref<32x128xf32, #tpu.memory_space<vmem>>, vector<32x128xf32>
    %cst = arith.constant dense<0.000000e+00> : vector<16x128xf32>
    %5 = tpu.matmul %3, %4, %cst {dimension_numbers = #tpu.dot_dimension_numbers<[1], [0], [0], [1], [0, 0, 1, 1], [], []>} : vector<16x32xf32>, vector<32x128xf32>, vector<16x128xf32> -> vector<16x128xf32>
    %c0_4 = arith.constant 0 : index
    %c0_5 = arith.constant 0 : index
    %6 = vector.load %arg4[%c0_4, %c0_5] : memref<1x128xf32, #tpu.memory_space<vmem>>, vector<1x128xf32>
    %7 = vector.broadcast %6 : vector<1x128xf32> to vector<16x128xf32>
    %8 = arith.addf %5, %7 : vector<16x128xf32>
    %cst_6 = arith.constant 0.000000e+00 : f32
    %9 = vector.broadcast %cst_6 : f32 to vector<16x128xf32>
    %10 = arith.maximumf %8, %9 : vector<16x128xf32>
    %c0_7 = arith.constant 0 : index
    %c0_8 = arith.constant 0 : index
    %11 = vector.load %arg7[%c0_7, %c0_8] : memref<16x32xf32, #tpu.memory_space<vmem>>, vector<16x32xf32>
    %c0_9 = arith.constant 0 : index
    %c0_10 = arith.constant 0 : index
    %12 = vector.load %arg5[%c0_9, %c0_10] : memref<128x32xf32, #tpu.memory_space<vmem>>, vector<128x32xf32>
    %cst_11 = arith.constant dense<0.000000e+00> : vector<16x32xf32>
    %13 = tpu.matmul %10, %12, %cst_11 {dimension_numbers = #tpu.dot_dimension_numbers<[1], [0], [0], [1], [0, 0, 1, 1], [], []>} : vector<16x128xf32>, vector<128x32xf32>, vector<16x32xf32> -> vector<16x32xf32>
    %14 = arith.addf %11, %13 : vector<16x32xf32>
    %c0_12 = arith.constant 0 : index
    %c0_13 = arith.constant 0 : index
    %15 = vector.load %arg7[%c0_12, %c0_13] : memref<16x32xf32, #tpu.memory_space<vmem>>, vector<16x32xf32>
    tpu.vector_store %arg7[%c0_12, %c0_13], %14 {strides = array<i32>} : memref<16x32xf32, #tpu.memory_space<vmem>>, vector<16x32xf32>,
    return
  }
  func.func @transform_0(%arg0: i32, %arg1: i32) -> (i32, i32) {
    %c0_i32 = arith.constant 0 : i32
    %c0_i32_0 = arith.constant 0 : i32
    return %arg0, %c0_i32 : i32, i32
  }
  func.func @transform_1(%arg0: i32, %arg1: i32) -> (i32, i32) {
    %c0_i32 = arith.constant 0 : i32
    %c0_i32_0 = arith.constant 0 : i32
    return %c0_i32, %arg1 : i32, i32
  }
  func.func @transform_2(%arg0: i32, %arg1: i32) -> (i32, i32) {
    %c0_i32 = arith.constant 0 : i32
    %c0_i32_0 = arith.constant 0 : i32
    return %c0_i32, %arg1 : i32, i32
  }
  func.func @transform_3(%arg0: i32, %arg1: i32) -> (i32, i32) {
    %c0_i32 = arith.constant 0 : i32
    %c0_i32_0 = arith.constant 0 : i32
    return %arg1, %c0_i32 : i32, i32
  }
  func.func @transform_4(%arg0: i32, %arg1: i32) -> (i32, i32) {
    %c0_i32 = arith.constant 0 : i32
    %c0_i32_0 = arith.constant 0 : i32
    %c0_i32_1 = arith.constant 0 : i32
    return %c0_i32, %c0_i32_0 : i32, i32
  }
  func.func @transform_5(%arg0: i32, %arg1: i32) -> (i32, i32) {
    %c0_i32 = arith.constant 0 : i32
    %c0_i32_0 = arith.constant 0 : i32
    return %arg0, %c0_i32 : i32, i32
  }
}

</mosaic_0001>

<bundles_post_ra>
// kernel: feed_forward.1
= control target key start
LH: loop header
LB: loop body
LE: loop exit
PB: predicated region body
PF: predicated region fallthrough
CT: control target
= control target key end

     0   :  { %vm29_vm0 = vcmask 261120   ;;  %s300_s0 = inlined_call_operand.vmem [shape: f32[16,32], index: 0, kind: input, shape index: {}]   ;;  %s301_s1 = inlined_call_operand.vmem [shape: f32[32,128], index: 1, kind: input, shape index: {}]   ;;  %s302_s2 = inlined_call_operand.vmem [shape: f32[1,128], index: 2, kind: input, shape index: {}]   ;;  %s303_s3 = inlined_call_operand.vmem [shape: f32[128,32], index: 3, kind: input, shape index: {}]   ;;  %s304_s4 = inlined_call_operand.vmem [shape: f32[1,32], index: 4, kind: input, shape index: {}]   ;;  %s305_s5 = inlined_call_operand.hbm [shape: f32[16,32], index: 5, kind: output, shape index: {}]  }
   0x1   :  { %v37_v0 = vld [vmem:[%s301_s1 + $0x18] sm:$0xff]  ;;  %v36_v1 = vld [vmem:[%s301_s1 + $0x10] sm:$0xff]  ;;  %v35_v2 = vld [vmem:[%s301_s1 + $0x8] sm:$0xff] }
   0x2   :  { %61 = vmatpush.msra.mxu0 %v37_v0  ;;  %v91_v3 = vld [vmem:[%s303_s3 + $0x78] sm:$0xff]  ;;  %v90_v4 = vld [vmem:[%s303_s3 + $0x70] sm:$0xff]  ;;  %v34_v5 = vld [vmem:[%s301_s1] sm:$0xff] }
   0x3   :  { %92 = vmatpush.msra.mxu1 %v91_v3  ;;  %v89_v6 = vld [vmem:[%s303_s3 + $0x68] sm:$0xff]  ;;  %139 = vmatpush.msra.mxu2 %v91_v3  ;;  %v32_v7 = vld [vmem:[%s300_s0] sm:$0xff] }
   0x4   :  { %62 = vmatpush.msra.mxu0 %v36_v1  ;;  %v88_v8 = vld [vmem:[%s303_s3 + $0x60] sm:$0xff] }
   0x5   :  { %93 = vmatpush.msra.mxu1 %v90_v4  ;;  %140 = vmatpush.msra.mxu2 %v90_v4 }
   0x6   :  { %63 = vmatpush.msra.mxu0 %v35_v2 }
   0x7   :  { %94 = vmatpush.msra.mxu1 %v89_v6 }
   0x8   :  { %64 = vmatpush.msra.mxu0 %v34_v5 }
   0x9   :  { %10 = vsyncpa [#allocation3], 0  ;;  %137 = vmatmul.msk.f32.vlgmr.msra.gmra.mxu0 %vm29_vm0, %v32_v7  ;;  %v87_v9 = vld [vmem:[%s303_s3 + $0x58] sm:$0xff]  ;;  %141 = vmatpush.msra.mxu2 %v89_v6  ;;  %v86_v10 = vld [vmem:[%s303_s3 + $0x50] sm:$0xff]  ;;  %s125_s15 = sshll.u32 %s305_s5, 4  ;;  %s188_s16 = smov 8   ;;  %s126_s15 = int_to_ptr.hbm [resolvable:$true] %s125_s15 }
   0xa   :  { %95 = vmatpush.msra.mxu1 %v88_v8  ;;  %v85_v11 = vld [vmem:[%s303_s3 + $0x48] sm:$0xff]  ;;  %v84_v13 = vld [vmem:[%s303_s3 + $0x40] sm:$0xff]  ;;  %v83_v14 = vld [vmem:[%s303_s3 + $0x38] sm:$0xff] }
   0xb   :  { %142 = vmatpush.msra.mxu2 %v88_v8  ;;  %v33_v12 = vld [vmem:[%s300_s0 + $0x8] sm:$0xff]  ;;  %v82_v15 = vld [vmem:[%s303_s3 + $0x30] sm:$0xff]  ;;  %v80_v17 = vld [vmem:[%s303_s3 + $0x20] sm:$0xff] }
   0xc   :  { %96 = vmatpush.msra.mxu1 %v87_v9  ;;  %v81_v16 = vld [vmem:[%s303_s3 + $0x28] sm:$0xff]  ;;  %v79_v18 = vld [vmem:[%s303_s3 + $0x18] sm:$0xff]  ;;  %v78_v19 = vld [vmem:[%s303_s3 + $0x10] sm:$0xff] }
   0xd   :  { %143 = vmatpush.msra.mxu2 %v87_v9  ;;  %v77_v20 = vld [vmem:[%s303_s3 + $0x8] sm:$0xff]  ;;  %v76_v21 = vld [vmem:[%s303_s3] sm:$0xff]  ;;  %s186_s3 = smov [#allocation2]  }
   0xe   :  { %97 = vmatpush.msra.mxu1 %v86_v10  ;;  %v159_v22 = vld [vmem:[%s304_s4] ss:$0 sm:$0xff]  ;;  %s123_s4 = sshll.u32 %s186_s3, 4  ;;  %s124_s4 = int_to_ptr.vmem [resolvable:$true] %s123_s4 }
   0xf   :  { %144 = vmatpush.msra.mxu2 %v86_v10  ;;  %30 = vst.msk [vmem:[#allocation2] sm:$0xff] %vm29_vm0, %v159_v22  ;;  %v158_v23 = vld [vmem:[%s302_s2] ss:$0 sm:$0xff]  ;;  %s187_s2 = smov 128  }
  0x10   :  { %98 = vmatpush.msra.mxu1 %v85_v11  ;;  %31 = vst.msk [vmem:[#allocation2 + $0x8] sm:$0xff] %vm29_vm0, %v159_v22 }
  0x11   :  { %138 = vmatmul.msk.f32.gmra.mxu0 %vm29_vm0, %v33_v12  ;;  %145 = vmatpush.msra.mxu2 %v85_v11 }
  0x12   :  { %99 = vmatpush.msra.mxu1 %v84_v13 }
  0x13   :  { %146 = vmatpush.msra.mxu2 %v84_v13 }
  0x14   :  { %100 = vmatpush.msra.mxu1 %v83_v14 }
  0x15   :  { %147 = vmatpush.msra.mxu2 %v83_v14 }
  0x16   :  { %101 = vmatpush.msra.mxu1 %v82_v15  ;;  %v74_v30 = vld [vmem:[#allocation2] sm:$0xff] }
  0x17   :  { %148 = vmatpush.msra.mxu2 %v82_v15  ;;  %v75_v33 = vld [vmem:[#allocation2 + $0x8] sm:$0xff] }
  0x18   :  { %102 = vmatpush.msra.mxu1 %v81_v16 }
  0x19   :  { %149 = vmatpush.msra.mxu2 %v81_v16 }
  0x1a   :  { %103 = vmatpush.msra.mxu1 %v80_v17 }
  0x1b   :  { %150 = vmatpush.msra.mxu2 %v80_v17 }
  0x1c   :  { %104 = vmatpush.msra.mxu1 %v79_v18 }
  0x1d   :  { %151 = vmatpush.msra.mxu2 %v79_v18 }
  0x1e   :  { %105 = vmatpush.msra.mxu1 %v78_v19 }
  0x1f   :  { %152 = vmatpush.msra.mxu2 %v78_v19 }
  0x20   :  { %106 = vmatpush.msra.mxu1 %v77_v20 }
  0x21   :  { %153 = vmatpush.msra.mxu2 %v77_v20 }
  0x22   :  { %107 = vmatpush.msra.mxu1 %v76_v21 }
  0x23   :  { %154 = vmatpush.msra.mxu2 %v76_v21 }
  0x86   :  { %v66_v24 = vpop.f32.mrf.mxu0 }
  0x87   :  { %v67_v25 = vadd.f32 %v158_v23, %v66_v24 }
  0x89   :  { %v72_v26 = vmax.f32 %v67_v25, 0.0 }
  0x8b   :  { %108 = vmatmul.f32.vlgmr.msra.gmra.mxu1 %v72_v26 }
  0x8e   :  { %v69_v27 = vpop.f32.mrf.mxu0 }
  0x8f   :  { %v70_v28 = vadd.f32 %v158_v23, %v69_v27 }
  0x91   :  { %v73_v29 = vmax.f32 %v70_v28, 0.0 }
  0x93   :  { %111 = vmatmul.f32.vlgmr.msra.gmra.mxu2 %v73_v29 }
 0x108   :  { %v109_v31 = vpop.f32.mrf.mxu1 }
 0x109   :  { %v115_v32 = vadd.f32 %v109_v31, %v74_v30 }
 0x10b   :  { %117 = vst.msk [vmem:[#allocation2] sm:$0xff] %vm29_vm0, %v115_v32 }
 0x116   :  { %v112_v34 = vpop.f32.mrf.mxu2 }
 0x117   :  { %v116_v35 = vadd.f32 %v112_v34, %v75_v33 }
 0x119   :  { %118 = vst.msk [vmem:[#allocation2 + $0x8] sm:$0xff] %vm29_vm0, %v116_v35 }
 0x11a   :  { %131 = dma.vmem_to_hbm [thread:$0]  %s124_s4, 256, %s126_s15, [#allocation3], %s187_s2, %s187_s2, %s188_s16  }
 0x11b   :  { %184 = dma.done.wait [#allocation3], 256  }
 0x11c   :  { %185 = vsyncadd [#allocation3], 4294967040 }
 0x11d   :  { %136 = vsyncpa [#allocation3], 1 }

</bundles_post_ra>
